<compile_context>
chip_gen: v7x
topology: tpu7x:2x2x1
jax: 0.10.0
libtpu: 0.0.40
codegen_flags: <defaults>
</compile_context>

<pallas_src>
import functools

import jax
import jax.numpy as jnp
from jax.experimental import pallas as pl
from jax.experimental.pallas import tpu as pltpu


def _cross_attn_kernel(a_ref, b_ref, na_ref, nb_ref, w_ref, bias_ref, out_ref,
                       *, compute_dtype):
    # a_ref: (bt, Sa, D), b_ref: (bt, Sb, D)
    # na_ref: (bt, 1, Sa), nb_ref: (bt, 1, Sb)  additive mask (0 valid / -1e9 pad)
    # w_ref: (3, D, Hp) = [W1+W3, W2-W3, W4] (zero-padded to Hp lanes)
    # bias_ref: (1, Hp) f32 ; out_ref: (bt, Sa+Sb, Hp)
    bt, sa, d = a_ref.shape
    sb = b_ref.shape[1]
    hp = w_ref.shape[2]
    s = sa + sb
    f32 = jnp.float32

    a32 = a_ref[...].astype(f32)                  # (bt, sa, d)
    b32 = b_ref[...].astype(f32)                  # (bt, sb, d)
    aq = a32.astype(compute_dtype)                # MXU operands (bf16 or f32)
    bq = b32.astype(compute_dtype)

    neg_a = na_ref[...]                           # (bt, 1, sa) f32
    neg_b = nb_ref[...]                           # (bt, 1, sb) f32

    # Row scores straight off the MXU (f32 accumulate).
    scores = jnp.einsum("bid,bjd->bij", aq, bq,
                        preferred_element_type=f32)       # (bt, sa, sb)
    if d >= 128:
        # Large D: the MXU already dominates, use the (otherwise idle) XLU.
        col_scores = jnp.swapaxes(scores, 1, 2)           # (bt, sb, sa)
    else:
        # Small D: recompute as a second cheap D-contraction (no XLU traffic).
        col_scores = jnp.einsum("bjd,bid->bji", bq, aq,
                                preferred_element_type=f32)

    def softmax_last(logits):                     # logits f32
        m = jnp.max(logits, axis=-1, keepdims=True)
        e = jnp.exp(logits - m)
        ssum = jnp.sum(e, axis=-1, keepdims=True)
        inv = pl.reciprocal(ssum, approx=True)    # EUP vrcp (free slot)
        inv = inv * (2.0 - ssum * inv)            # one Newton step -> ~f32 acc.
        return e * inv

    row_attn = softmax_last(scores + neg_b)       # (bt, sa, sb)
    col_attn = softmax_last(col_scores + neg_a)   # (bt, sb, sa)

    attn_a = jnp.einsum("bij,bjd->bid", row_attn.astype(compute_dtype), bq,
                        preferred_element_type=f32)        # (bt, sa, d)
    attn_b = jnp.einsum("bji,bid->bjd", col_attn.astype(compute_dtype), aq,
                        preferred_element_type=f32)        # (bt, sb, d)

    # Fused a/b projection: stack the two sides along the sequence axis and
    # fold (bt, Sa+Sb) into the matmul M dimension (no weight broadcast, no
    # (S, 4D) concat). Split-weight identity:
    #   concat([x, t, x-t, x*t]) @ W == x@(W1+W3) + t@(W2-W3) + (x*t)@W4
    x2 = jnp.concatenate([a32, b32], axis=1).reshape(bt * s, d)       # f32
    t2 = jnp.concatenate([attn_a, attn_b], axis=1).reshape(bt * s, d)  # f32
    p2 = x2 * t2                                                       # f32

    w_x = w_ref[0]                                # (d, hp), compute dtype
    w_t = w_ref[1]
    w_p = w_ref[2]

    acc = jnp.dot(x2.astype(compute_dtype), w_x, preferred_element_type=f32)
    acc = acc + jnp.dot(t2.astype(compute_dtype), w_t,
                        preferred_element_type=f32)
    acc = acc + jnp.dot(p2.astype(compute_dtype), w_p,
                        preferred_element_type=f32)
    acc = jnp.maximum(acc + bias_ref[...], 0.0)   # bias/ReLU epilogue in f32

    # Single full-block, lane-dense store.
    out_ref[...] = acc.reshape(bt, s, hp).astype(out_ref.dtype)


def _vmem_capacity_bytes():
    try:
        return int(pltpu.get_tpu_info().vmem_capacity_bytes)
    except Exception:
        return 64 * 1024 * 1024                   # conservative (v7x-sized)


def _pick_batch_tile(B, Sa, Sb, D, Hp, vmem_budget, max_batch_tile):
    """Largest batch tile that fits the VMEM budget (then megacore guard)."""
    S = Sa + Sb
    # Double-buffered pipeline I/O per batch row (a, b, masks, out), f32.
    io_bytes = 2 * (Sa * D + Sb * D + Sa + Sb + S * Hp) * 4
    # Live in-kernel intermediates per batch row (scores x2, probs x2,
    # attn/x/prod, projection accumulator), f32.
    live_bytes = (4 * Sa * Sb + 3 * S * D + S * Hp) * 4
    per_row = io_bytes + live_bytes
    fixed = 2 * (3 * D * Hp + Hp) * 4             # resident weights + bias
    bt = max(1, (vmem_budget - fixed) // per_row)
    bt = int(min(bt, max_batch_tile, B))
    # Keep >= 2 grid steps when B > 1 so both v7x TensorCores get work.
    if B > 1 and -(-B // bt) < 2:
        bt = -(-B // 2)
    return int(max(1, bt))


def cross_attention(a, b, mask_a, mask_b, w, bias, *,
                    compute_dtype=jnp.float32, max_batch_tile=128):
    """Pallas CrossAttention forward (eval mode).

    a: [B, Sa, D], b: [B, Sb, D]
    mask_a: [B, Sa], mask_b: [B, Sb]   (1 = valid token, 0 = padding)
    w: [4*D, H] (x @ W layout), bias: [H]
    compute_dtype: MXU operand dtype (jnp.float32 or jnp.bfloat16; accumulation
                   and the softmax / bias / ReLU epilogue stay in f32).
    returns (out_a [B, Sa, H], out_b [B, Sb, H])
    """
    B, Sa, D = a.shape
    Sb = b.shape[1]
    H = w.shape[1]
    assert w.shape[0] == 4 * D
    S = Sa + Sb
    f32 = jnp.float32

    # Lane-dense output: pad H up to a multiple of 128 (padded weight/bias
    # columns are zero, so ReLU output there is exactly 0 and sliced off).
    Hp = ((H + 127) // 128) * 128

    # Additive mask bias: 0.0 at valid tokens, -1e9 at padding (replaces the
    # in-kernel compare+select; matches masked_fill(-1e9) up to |scores|/1e9).
    neg_a = ((mask_a.astype(f32) - 1.0) * 1e9).reshape(B, 1, Sa)
    neg_b = ((mask_b.astype(f32) - 1.0) * 1e9).reshape(B, 1, Sb)

    # Pre-combine the four (D, H) row-blocks of the dense weight once, outside
    # the kernel, and zero-pad the output dimension to Hp lanes.
    wf = w.astype(f32)
    w3 = jnp.stack(
        [wf[:D] + wf[2 * D:3 * D],        # multiplies x
         wf[D:2 * D] - wf[2 * D:3 * D],   # multiplies attn_x
         wf[3 * D:]],                     # multiplies x * attn_x
        axis=0)                           # (3, D, H)
    w3 = jnp.pad(w3, ((0, 0), (0, 0), (0, Hp - H))).astype(compute_dtype)
    bias2 = jnp.pad(bias.astype(f32), (0, Hp - H)).reshape(1, Hp)

    # VMEM-budgeted batch tile (v7x: 64 MiB, v5e/v6e: 128 MiB physical).
    vmem_budget = int(_vmem_capacity_bytes() * 0.75)
    bt = _pick_batch_tile(B, Sa, Sb, D, Hp, vmem_budget, max_batch_tile)

    # Pad the batch so the grid is exact for any B (padded rows are fully
    # masked and discarded after the call).
    Bp = -(-B // bt) * bt
    if Bp != B:
        pad = Bp - B
        a = jnp.pad(a, ((0, pad), (0, 0), (0, 0)))
        b = jnp.pad(b, ((0, pad), (0, 0), (0, 0)))
        neg_a = jnp.pad(neg_a, ((0, pad), (0, 0), (0, 0)),
                        constant_values=-1e9)
        neg_b = jnp.pad(neg_b, ((0, pad), (0, 0), (0, 0)),
                        constant_values=-1e9)
    grid = (Bp // bt,)

    # Advisory cost estimate for the XLA scheduler.
    score_flops = 2 * Bp * Sa * Sb * D * (1 if D >= 128 else 2)
    attn_flops = 2 * 2 * Bp * Sa * Sb * D
    proj_flops = 3 * 2 * Bp * S * D * Hp
    cost = pl.CostEstimate(
        flops=int(score_flops + attn_flops + proj_flops),
        transcendentals=int(2 * Bp * Sa * Sb + 2 * Bp * S),
        bytes_accessed=int(
            4 * (Bp * (Sa * D + Sb * D + Sa + Sb + S * Hp) + 3 * D * Hp + Hp)))

    grid_spec = pltpu.PrefetchScalarGridSpec(
        num_scalar_prefetch=0,
        grid=grid,
        in_specs=[
            pl.BlockSpec((bt, Sa, D), lambda i: (i, 0, 0)),
            pl.BlockSpec((bt, Sb, D), lambda i: (i, 0, 0)),
            pl.BlockSpec((bt, 1, Sa), lambda i: (i, 0, 0)),
            pl.BlockSpec((bt, 1, Sb), lambda i: (i, 0, 0)),
            pl.BlockSpec((3, D, Hp), lambda i: (0, 0, 0)),   # resident weights
            pl.BlockSpec((1, Hp), lambda i: (0, 0)),          # resident bias
        ],
        out_specs=pl.BlockSpec((bt, S, Hp), lambda i: (i, 0, 0)),
    )

    kernel = functools.partial(_cross_attn_kernel, compute_dtype=compute_dtype)

    out = pl.pallas_call(
        kernel,
        out_shape=jax.ShapeDtypeStruct((Bp, S, Hp), a.dtype),
        grid_spec=grid_spec,
        compiler_params=pltpu.CompilerParams(
            dimension_semantics=("parallel",),
            vmem_limit_bytes=vmem_budget),
        cost_estimate=cost,
    )(a, b, neg_a, neg_b, w3, bias2)

    out = out[:B, :, :H]
    return out[:, :Sa, :], out[:, Sa:, :]


def cross_attention_ref(a, b, mask_a, mask_b, w, bias):
    """Pure-JAX reference mirroring the PyTorch forward (eval mode)."""
    scores = jnp.einsum("bid,bjd->bij", a, b)
    row = jnp.where(mask_b[:, None, :] < 0.5, -1e9, scores)
    row = jax.nn.softmax(row, axis=2)
    col = jnp.where(mask_a[:, None, :] < 0.5, -1e9,
                    jnp.transpose(scores, (0, 2, 1)))
    col = jax.nn.softmax(col, axis=2)
    attn_a = jnp.einsum("bij,bjd->bid", row, b)
    attn_b = jnp.einsum("bij,bjd->bid", col, a)
    fa = jnp.concatenate([a, attn_a, a - attn_a, a * attn_a], axis=-1)
    fb = jnp.concatenate([b, attn_b, b - attn_b, b * attn_b], axis=-1)
    oa = jax.nn.relu(fa @ w + bias)
    ob = jax.nn.relu(fb @ w + bias)
    return oa, ob


if __name__ == "__main__":
    key = jax.random.PRNGKey(0)
    B, Sa, Sb, D = 2, 8, 8, 32        # dense: Linear(4*32, 16)
    H = D // 2

    k1, k2, k3, k4 = jax.random.split(key, 4)
    a = jax.random.normal(k1, (B, Sa, D), dtype=jnp.float32)
    b = jax.random.normal(k2, (B, Sb, D), dtype=jnp.float32)

    # deterministic padding masks (1 = valid token, 0 = padding)
    lens_a = jnp.array([Sa, 5], dtype=jnp.int32)
    lens_b = jnp.array([Sb, 6], dtype=jnp.int32)
    mask_a = (jnp.arange(Sa)[None, :] < lens_a[:, None]).astype(jnp.float32)
    mask_b = (jnp.arange(Sb)[None, :] < lens_b[:, None]).astype(jnp.float32)

    # deterministic dense parameters: Linear(4*D, D//2), stored as [4D, H]
    w = (jax.random.normal(k3, (4 * D, H), dtype=jnp.float32) *
         (1.0 / jnp.sqrt(4.0 * D)))
    bias = jax.random.normal(k4, (H,), dtype=jnp.float32) * 0.01

    ref_a, ref_b = cross_attention_ref(a, b, mask_a, mask_b, w, bias)

    # f32 MXU path: numerical-parity validation against the f32 reference.
    out_a, out_b = cross_attention(a, b, mask_a, mask_b, w, bias,
                                   compute_dtype=jnp.float32)
    out_a = jax.block_until_ready(out_a)
    out_b = jax.block_until_ready(out_b)
    assert jnp.allclose(out_a, ref_a, atol=1e-4, rtol=1e-4)
    assert jnp.allclose(out_b, ref_b, atol=1e-4, rtol=1e-4)

    # bf16 MXU path (production fast path): looser tolerance vs f32 reference.
    bf_a, bf_b = cross_attention(a, b, mask_a, mask_b, w, bias,
                                 compute_dtype=jnp.bfloat16)
    bf_a = jax.block_until_ready(bf_a)
    bf_b = jax.block_until_ready(bf_b)
    assert jnp.allclose(bf_a, ref_a, atol=1.5e-1, rtol=1e-1)
    assert jnp.allclose(bf_b, ref_b, atol=1.5e-1, rtol=1e-1)

    print("KERNEL_OK")
</pallas_src>

<mosaic_0001>
module attributes {stable_mosaic.version = 11 : i64} {
  func.func @_cross_attn_kernel(%arg0: i32, %arg1: memref<1x8x32xf32, #tpu.memory_space<vmem>>, %arg2: memref<1x8x32xf32, #tpu.memory_space<vmem>>, %arg3: memref<1x1x8xf32, #tpu.memory_space<vmem>>, %arg4: memref<1x1x8xf32, #tpu.memory_space<vmem>>, %arg5: memref<3x32x128xf32, #tpu.memory_space<vmem>>, %arg6: memref<1x128xf32, #tpu.memory_space<vmem>>, %arg7: memref<1x16x128xf32, #tpu.memory_space<vmem>>) attributes {dimension_semantics = [#tpu.dimension_semantics<parallel>], iteration_bounds = array<i64: 2>, scalar_prefetch = 0 : i64, scratch_operands = 0 : i64, tpu.core_type = #tpu.core_type<tc>, window_params = [{transform_indices = @transform_0, window_bounds = array<i64: 1, 8, 32>}, {transform_indices = @transform_1, window_bounds = array<i64: 1, 8, 32>}, {transform_indices = @transform_2, window_bounds = array<i64: 1, 1, 8>}, {transform_indices = @transform_3, window_bounds = array<i64: 1, 1, 8>}, {pipeline_mode = #tpu.pipeline_mode<synchronous>, transform_indices = @transform_4, window_bounds = array<i64: 3, 32, 128>}, {pipeline_mode = #tpu.pipeline_mode<synchronous>, transform_indices = @transform_5, window_bounds = array<i64: 1, 128>}, {transform_indices = @transform_6, window_bounds = array<i64: 1, 16, 128>}]} {
    %c0 = arith.constant 0 : index
    %c0_0 = arith.constant 0 : index
    %c0_1 = arith.constant 0 : index
    %0 = vector.load %arg1[%c0, %c0_0, %c0_1] : memref<1x8x32xf32, #tpu.memory_space<vmem>>, vector<1x8x32xf32>
    %c0_2 = arith.constant 0 : index
    %c0_3 = arith.constant 0 : index
    %c0_4 = arith.constant 0 : index
    %1 = vector.load %arg2[%c0_2, %c0_3, %c0_4] : memref<1x8x32xf32, #tpu.memory_space<vmem>>, vector<1x8x32xf32>
    %c0_5 = arith.constant 0 : index
    %c0_6 = arith.constant 0 : index
    %c0_7 = arith.constant 0 : index
    %2 = vector.load %arg3[%c0_5, %c0_6, %c0_7] : memref<1x1x8xf32, #tpu.memory_space<vmem>>, vector<1x1x8xf32>
    %c0_8 = arith.constant 0 : index
    %c0_9 = arith.constant 0 : index
    %c0_10 = arith.constant 0 : index
    %3 = vector.load %arg4[%c0_8, %c0_9, %c0_10] : memref<1x1x8xf32, #tpu.memory_space<vmem>>, vector<1x1x8xf32>
    "tpu.trace_start"() <{level = 10 : i32, message = "bid,bjd->bij"}> : () -> ()
    %cst = arith.constant dense<0.000000e+00> : vector<1x8x8xf32>
    %4 = tpu.matmul %0, %1, %cst {dimension_numbers = #tpu.dot_dimension_numbers<[2], [2], [1], [1], [0, 0, 0, 1, 1, 1], [0], [0]>} : vector<1x8x32xf32>, vector<1x8x32xf32>, vector<1x8x8xf32> -> vector<1x8x8xf32>
    "tpu.trace_stop"() : () -> ()
    "tpu.trace_start"() <{level = 10 : i32, message = "bjd,bid->bji"}> : () -> ()
    %cst_11 = arith.constant dense<0.000000e+00> : vector<1x8x8xf32>
    %5 = tpu.matmul %1, %0, %cst_11 {dimension_numbers = #tpu.dot_dimension_numbers<[2], [2], [1], [1], [0, 0, 0, 1, 1, 1], [0], [0]>} : vector<1x8x32xf32>, vector<1x8x32xf32>, vector<1x8x8xf32> -> vector<1x8x8xf32>
    "tpu.trace_stop"() : () -> ()
    %6 = vector.broadcast %3 : vector<1x1x8xf32> to vector<1x8x8xf32>
    %7 = arith.addf %4, %6 : vector<1x8x8xf32>
    %cst_12 = arith.constant dense<0xFF800000> : vector<1x8xf32>
    %8 = vector.multi_reduction <maximumf>, %7, %cst_12 [2] : vector<1x8x8xf32> to vector<1x8xf32>
    %9 = vector.shape_cast %8 : vector<1x8xf32> to vector<1x8x1xf32>
    %10 = vector.broadcast %9 : vector<1x8x1xf32> to vector<1x8x8xf32>
    %11 = arith.subf %7, %10 : vector<1x8x8xf32>
    %12 = math.exp %11 : vector<1x8x8xf32>
    %cst_13 = arith.constant dense<0.000000e+00> : vector<1x8xf32>
    %13 = vector.multi_reduction <add>, %12, %cst_13 [2] : vector<1x8x8xf32> to vector<1x8xf32>
    %14 = vector.shape_cast %13 : vector<1x8xf32> to vector<1x8x1xf32>
    %15 = tpu.reciprocal %14 {approx = true} : vector<1x8x1xf32> -> vector<1x8x1xf32>
    %16 = arith.mulf %14, %15 : vector<1x8x1xf32>
    %cst_14 = arith.constant 2.000000e+00 : f32
    %17 = vector.broadcast %cst_14 : f32 to vector<1x8x1xf32>
    %18 = arith.subf %17, %16 : vector<1x8x1xf32>
    %19 = arith.mulf %15, %18 : vector<1x8x1xf32>
    %20 = vector.broadcast %19 : vector<1x8x1xf32> to vector<1x8x8xf32>
    %21 = arith.mulf %12, %20 : vector<1x8x8xf32>
    %22 = vector.broadcast %2 : vector<1x1x8xf32> to vector<1x8x8xf32>
    %23 = arith.addf %5, %22 : vector<1x8x8xf32>
    %cst_15 = arith.constant dense<0xFF800000> : vector<1x8xf32>
    %24 = vector.multi_reduction <maximumf>, %23, %cst_15 [2] : vector<1x8x8xf32> to vector<1x8xf32>
    %25 = vector.shape_cast %24 : vector<1x8xf32> to vector<1x8x1xf32>
    %26 = vector.broadcast %25 : vector<1x8x1xf32> to vector<1x8x8xf32>
    %27 = arith.subf %23, %26 : vector<1x8x8xf32>
    %28 = math.exp %27 : vector<1x8x8xf32>
    %cst_16 = arith.constant dense<0.000000e+00> : vector<1x8xf32>
    %29 = vector.multi_reduction <add>, %28, %cst_16 [2] : vector<1x8x8xf32> to vector<1x8xf32>
    %30 = vector.shape_cast %29 : vector<1x8xf32> to vector<1x8x1xf32>
    %31 = tpu.reciprocal %30 {approx = true} : vector<1x8x1xf32> -> vector<1x8x1xf32>
    %32 = arith.mulf %30, %31 : vector<1x8x1xf32>
    %cst_17 = arith.constant 2.000000e+00 : f32
    %33 = vector.broadcast %cst_17 : f32 to vector<1x8x1xf32>
    %34 = arith.subf %33, %32 : vector<1x8x1xf32>
    %35 = arith.mulf %31, %34 : vector<1x8x1xf32>
    %36 = vector.broadcast %35 : vector<1x8x1xf32> to vector<1x8x8xf32>
    %37 = arith.mulf %28, %36 : vector<1x8x8xf32>
    "tpu.trace_start"() <{level = 10 : i32, message = "bij,bjd->bid"}> : () -> ()
    %cst_18 = arith.constant dense<0.000000e+00> : vector<1x8x32xf32>
    %38 = tpu.matmul %21, %1, %cst_18 {dimension_numbers = #tpu.dot_dimension_numbers<[2], [1], [1], [2], [0, 0, 0, 1, 1, 2], [0], [0]>} : vector<1x8x8xf32>, vector<1x8x32xf32>, vector<1x8x32xf32> -> vector<1x8x32xf32>
    "tpu.trace_stop"() : () -> ()
    "tpu.trace_start"() <{level = 10 : i32, message = "bji,bid->bjd"}> : () -> ()
    %cst_19 = arith.constant dense<0.000000e+00> : vector<1x8x32xf32>
    %39 = tpu.matmul %37, %0, %cst_19 {dimension_numbers = #tpu.dot_dimension_numbers<[2], [1], [1], [2], [0, 0, 0, 1, 1, 2], [0], [0]>} : vector<1x8x8xf32>, vector<1x8x32xf32>, vector<1x8x32xf32> -> vector<1x8x32xf32>
    "tpu.trace_stop"() : () -> ()
    %40 = tpu.concatenate %0, %1 in 1 : vector<1x8x32xf32>, vector<1x8x32xf32> -> vector<1x16x32xf32>
    %41 = vector.shape_cast %40 : vector<1x16x32xf32> to vector<16x32xf32>
    %42 = tpu.concatenate %38, %39 in 1 : vector<1x8x32xf32>, vector<1x8x32xf32> -> vector<1x16x32xf32>
    %43 = vector.shape_cast %42 : vector<1x16x32xf32> to vector<16x32xf32>
    %44 = arith.mulf %41, %43 : vector<16x32xf32>
    %c0_20 = arith.constant 0 : index
    %c0_21 = arith.constant 0 : index
    %c0_22 = arith.constant 0 : index
    %45 = vector.load %arg5[%c0_20, %c0_21, %c0_22] : memref<3x32x128xf32, #tpu.memory_space<vmem>>, vector<1x32x128xf32>
    %46 = vector.shape_cast %45 : vector<1x32x128xf32> to vector<32x128xf32>
    %c1 = arith.constant 1 : index
    %c0_23 = arith.constant 0 : index
    %c0_24 = arith.constant 0 : index
    %47 = vector.load %arg5[%c1, %c0_23, %c0_24] : memref<3x32x128xf32, #tpu.memory_space<vmem>>, vector<1x32x128xf32>
    %48 = vector.shape_cast %47 : vector<1x32x128xf32> to vector<32x128xf32>
    %c2 = arith.constant 2 : index
    %c0_25 = arith.constant 0 : index
    %c0_26 = arith.constant 0 : index
    %49 = vector.load %arg5[%c2, %c0_25, %c0_26] : memref<3x32x128xf32, #tpu.memory_space<vmem>>, vector<1x32x128xf32>
    %50 = vector.shape_cast %49 : vector<1x32x128xf32> to vector<32x128xf32>
    %cst_27 = arith.constant dense<0.000000e+00> : vector<16x128xf32>
    %51 = tpu.matmul %41, %46, %cst_27 {dimension_numbers = #tpu.dot_dimension_numbers<[1], [0], [0], [1], [0, 0, 1, 1], [], []>} : vector<16x32xf32>, vector<32x128xf32>, vector<16x128xf32> -> vector<16x128xf32>
    %cst_28 = arith.constant dense<0.000000e+00> : vector<16x128xf32>
    %52 = tpu.matmul %43, %48, %cst_28 {dimension_numbers = #tpu.dot_dimension_numbers<[1], [0], [0], [1], [0, 0, 1, 1], [], []>} : vector<16x32xf32>, vector<32x128xf32>, vector<16x128xf32> -> vector<16x128xf32>
    %53 = arith.addf %51, %52 : vector<16x128xf32>
    %cst_29 = arith.constant dense<0.000000e+00> : vector<16x128xf32>
    %54 = tpu.matmul %44, %50, %cst_29 {dimension_numbers = #tpu.dot_dimension_numbers<[1], [0], [0], [1], [0, 0, 1, 1], [], []>} : vector<16x32xf32>, vector<32x128xf32>, vector<16x128xf32> -> vector<16x128xf32>
    %55 = arith.addf %53, %54 : vector<16x128xf32>
    %c0_30 = arith.constant 0 : index
    %c0_31 = arith.constant 0 : index
    %56 = vector.load %arg6[%c0_30, %c0_31] : memref<1x128xf32, #tpu.memory_space<vmem>>, vector<1x128xf32>
    %57 = vector.broadcast %56 : vector<1x128xf32> to vector<16x128xf32>
    %58 = arith.addf %55, %57 : vector<16x128xf32>
    %cst_32 = arith.constant 0.000000e+00 : f32
    %59 = vector.broadcast %cst_32 : f32 to vector<16x128xf32>
    %60 = arith.maximumf %58, %59 : vector<16x128xf32>
    %61 = vector.shape_cast %60 : vector<16x128xf32> to vector<1x16x128xf32>
    %c0_33 = arith.constant 0 : index
    %c0_34 = arith.constant 0 : index
    %c0_35 = arith.constant 0 : index
    %62 = vector.load %arg7[%c0_33, %c0_34, %c0_35] : memref<1x16x128xf32, #tpu.memory_space<vmem>>, vector<1x16x128xf32>
    tpu.vector_store %arg7[%c0_33, %c0_34, %c0_35], %61 {strides = array<i32>} : memref<1x16x128xf32, #tpu.memory_space<vmem>>, vector<1x16x128xf32>,
    return
  }
  func.func @transform_0(%arg0: i32) -> (i32, i32, i32) {
    %c0_i32 = arith.constant 0 : i32
    %c0_i32_0 = arith.constant 0 : i32
    %c0_i32_1 = arith.constant 0 : i32
    return %arg0, %c0_i32, %c0_i32_0 : i32, i32, i32
  }
  func.func @transform_1(%arg0: i32) -> (i32, i32, i32) {
    %c0_i32 = arith.constant 0 : i32
    %c0_i32_0 = arith.constant 0 : i32
    %c0_i32_1 = arith.constant 0 : i32
    return %arg0, %c0_i32, %c0_i32_0 : i32, i32, i32
  }
  func.func @transform_2(%arg0: i32) -> (i32, i32, i32) {
    %c0_i32 = arith.constant 0 : i32
    %c0_i32_0 = arith.constant 0 : i32
    %c0_i32_1 = arith.constant 0 : i32
    return %arg0, %c0_i32, %c0_i32_0 : i32, i32, i32
  }
  func.func @transform_3(%arg0: i32) -> (i32, i32, i32) {
    %c0_i32 = arith.constant 0 : i32
    %c0_i32_0 = arith.constant 0 : i32
    %c0_i32_1 = arith.constant 0 : i32
    return %arg0, %c0_i32, %c0_i32_0 : i32, i32, i32
  }
  func.func @transform_4(%arg0: i32) -> (i32, i32, i32) {
    %c0_i32 = arith.constant 0 : i32
    %c0_i32_0 = arith.constant 0 : i32
    %c0_i32_1 = arith.constant 0 : i32
    %c0_i32_2 = arith.constant 0 : i32
    return %c0_i32, %c0_i32_0, %c0_i32_1 : i32, i32, i32
  }
  func.func @transform_5(%arg0: i32) -> (i32, i32) {
    %c0_i32 = arith.constant 0 : i32
    %c0_i32_0 = arith.constant 0 : i32
    %c0_i32_1 = arith.constant 0 : i32
    return %c0_i32, %c0_i32_0 : i32, i32
  }
  func.func @transform_6(%arg0: i32) -> (i32, i32, i32) {
    %c0_i32 = arith.constant 0 : i32
    %c0_i32_0 = arith.constant 0 : i32
    %c0_i32_1 = arith.constant 0 : i32
    return %arg0, %c0_i32, %c0_i32_0 : i32, i32, i32
  }
}

</mosaic_0001>

<bundles_post_ra>
// kernel: tpu_custom_call.1
= control target key start
LH: loop header
LB: loop body
LE: loop exit
PB: predicated region body
PF: predicated region fallthrough
CT: control target
= control target key end

     0   :  { %s1793_s0 = inlined_call_operand.hbm [shape: f32[2,8,32], index: 0, kind: input, shape index: {}]   ;;  %s1794_s1 = inlined_call_operand.hbm [shape: f32[2,8,32], index: 1, kind: input, shape index: {}]   ;;  %s1795_s2 = inlined_call_operand.vmem [shape: f32[2,1,8], index: 2, kind: input, shape index: {}]   ;;  %s1796_s3 = inlined_call_operand.vmem [shape: f32[2,1,8], index: 3, kind: input, shape index: {}]   ;;  %s1797_s4 = inlined_call_operand.hbm [shape: f32[3,32,128], index: 4, kind: input, shape index: {}]   ;;  %s1798_s5 = inlined_call_operand.vmem [shape: f32[1,128], index: 5, kind: input, shape index: {}]   ;;  %s1799_s6 = inlined_call_operand.hbm [shape: f32[2,16,128], index: 6, kind: output, shape index: {}]  }
   0x1   :  { %1805 = sst [smem:[#allocation15_spill]] %s1797_s4 }
   0x2   :  { %11 = vsyncpa [#allocation3], 0 }
   0x3   :  { %13 = vsyncpa [#allocation3 + $0x1], 0 }
   0x4   :  { %14 = vsyncpa [#allocation6], 0 }
   0x5   :  { %16 = vsyncpa [#allocation6 + $0x1], 0 }
   0x6   :  { %17 = vsyncpa [#allocation4], 0 }
   0x7   :  { %19 = vsyncpa [#allocation4 + $0x1], 0  ;;  %s1515_s21 = smov 0   ;;  %s1517_s22 = smov 0  }
   0x8   :  { %s1519_s23 = smov 0   ;;  %s1521_s24 = smov 0  }
   0x9 LB: > { %1806 = sst [smem:[#allocation13_spill]] %s1464_s23  ;;  %s1536_s25 = sadd.s32 4294967295, %s1468_s24   ;;  %s1468_s24 = sphi %s1521_s24, %s1827_s24   ;;  %s1464_s23 = sphi %s1519_s23, %s1824_s23   ;;  %s1460_s22 = sphi %s1517_s22, %s1826_s22   ;;  %s1456_s21 = sphi %s1515_s21, %s1825_s21  }
   0xa   : > { %s1089_s26 = sadd.s32 4294967294, %s1468_s24   ;;  %p45_p0 = scmp.ne.s32.totalorder %s1460_s22, %s1456_s21 }
   0xb   : > { %p1800_p1 = scmp.eq.s32.totalorder %s1536_s25, 0  ;;  %p195_p3 = scmp.eq.s32.totalorder %s1089_s26, 1 }
   0xc   : > { %p1090_p5 = scmp.ge.s32.totalorder %s1468_s24, 1  ;;  %p202_p7 = scmp.lt.s32.totalorder %s1468_s24, 3 }
   0xd   : > { %p1545_p4 = por %p1800_p1, %p45_p0  ;;  %p1550_p6 = por %p195_p3, %p45_p0 }
   0xe   : > { %p1555_p8 = pnand %p1090_p5, %p202_p7  ;;  %s1470_s30 = smov [#allocation7]  }
   0xf   : > { %s1807_s27 = scalar_select %p1545_p4, 1, 0 }
  0x10   : > { %s1808_s28 = scalar_select %p1550_p6, 1, 0 }
  0x11   : > { %s1809_s29 = scalar_select %p1555_p8, 1, 0 }
  0x12   : > { %s214_s7 = sshll.u32 %s1470_s30, 4  ;;  %p1240_p9 = pneg %p1555_p8  ;;  %s1559_s7 = int_to_ptr.vmem [resolvable:$true] %s214_s7 }
  0x13   : > { %s1571_s9 = sadd.s32 1, %s1468_s24   ;;  %s32_s10 = sadd.s32 1, %s1464_s23 }
  0x14   : > { %p1566_p11 = pnand %p1240_p9, %p1800_p1  ;;  %s29_s11 = ssub.s32 %s1468_s24, %s1571_s9 }
  0x15   : > { %s1811_s4 = sld [smem:[#allocation15_spill]] }
  0x16   : > { %p1308_p13 = pneg %p1566_p11 }
  0x1b   : > { %s1306_s14 = scalar_lea.hbm %s1811_s4, 1536 }
  0x1c   : > { %p1307_p12 = scmp.ne.s32.totalorder %s1811_s4, %s1306_s14  ;;  %p1313_p5 = scmp.lt.u32.totalorder %s1306_s14, %s1811_s4 }
  0x1e   : > { %p1309_p0 = pnand %p1308_p13, %p1307_p12 }
  0x20   : > { %p1310_p3 = pneg %p1309_p0 }
  0x22   : > { %p1315_p7 = pnand %p1313_p5, %p1310_p3 }
  0x24   : > { %1318 = shalt.err (!%p1315_p7)
}
  0x25   : > { %s1319_s19 = scalar_lea.vmem %s1559_s7, 1536  ;;  %p1327_p2 = scmp.lt.s32.totalorder %s1559_s7, %s1559_s7 }
  0x26   : > { %p1320_p9 = scmp.ne.s32.totalorder %s1559_s7, %s1319_s19  ;;  %p1328_p6 = scmp.lt.s32.totalorder %s1319_s19, %s1319_s19 }
  0x28   : > { %p1322_p10 = pnand %p1320_p9, %p1308_p13  ;;  %p1329_p4 = por %p1328_p6, %p1327_p2 }
  0x2a   : > { %p1323_p1 = pneg %p1322_p10 }
  0x2c   : > { %p1330_p8 = pnand %p1329_p4, %p1323_p1 }
  0x2e   : > { %1333 = shalt.err (!%p1330_p8)
}
  0x2f   : > { %s1471_s20 = smov 128   ;;  %s1472_s26 = smov 8  }
  0x30   : > { %1243 = dma.hbm_to_vmem [thread:$0]  (!%p1566_p11), %s1811_s4, 1536, %s1559_s7, [#allocation6], %s1471_s20, %s1471_s20, %s1472_s26  }
  0x31   : > { %p30_p2 = scmp.eq.s32.totalorder %s29_s11, 0  ;;  %p39_p1 = scmp.ne.s32.totalorder %s1464_s23, %s1460_s22 }
  0x32   : > { %p40_p4 = scmp.eq.s32.totalorder %s1468_s24, 0  ;;  %p1256_p6 = scmp.lt.s32.totalorder %s1468_s24, 2 }
  0x33   : > { %s1602_s13 = scalar_select %p30_p2, %s1464_s23, %s32_s10  }
  0x34   : > { %p41_p8 = por %p40_p4, %p39_p1  ;;  %p1813_p10 = scmp.eq.s32.totalorder %s1536_s25, 1 }
  0x35   : > { %1812 = sst [smem:[#allocation14_spill]] %s1602_s13  ;;  %s231_s15 = sand.u32 1, %s1464_s23  }
  0x36   : > { %p1606_p12 = por %p1813_p10, %p39_p1  ;;  %s1094_s16 = sshll.u32 %s1468_s24, 7 }
  0x37   : > { %s1612_s17 = sshll.u32 %s231_s15, 3  ;;  %s1617_s7 = scalar_lea.hbm %s1793_s0, %s1094_s16 }
  0x38   : > { %s1814_s14 = scalar_select %p1606_p12, 1, 0 }
  0x39   : > { %s235_s10 = scalar_lea.vmem [#allocation2], %s1612_s17  ;;  %p1620_p11 = pnand %p1256_p6, %p41_p8 }
  0x3a   : > { %s242_s11 = sshll.u32 %s235_s10, 4  ;;  %s1629_s30 = scalar_lea.hbm %s1794_s1, %s1094_s16  ;;  %s1624_s11 = int_to_ptr.vmem [resolvable:$true] %s242_s11 }
  0x3b   : > { %s232_s12 = scalar_lea.sflag [#allocation3], %s231_s15  ;;  %s1334_s8 = scalar_lea.hbm %s1617_s7, 128 }
  0x3c   : > { %p1335_p13 = scmp.ne.s32.totalorder %s1617_s7, %s1334_s8  ;;  %p1336_p0 = pneg %p1620_p11 }
  0x3d   : > { %s1339_s4 = scalar_lea.hbm %s1793_s0, 256  ;;  %p1340_p7 = scmp.lt.u32.totalorder %s1617_s7, %s1793_s0 }
  0x3e   : > { %p1337_p3 = pnand %p1336_p0, %p1335_p13  ;;  %p1341_p9 = scmp.lt.u32.totalorder %s1339_s4, %s1334_s8 }
  0x3f   : > { %p1343_p1 = scmp.lt.u32.totalorder %s1334_s8, %s1617_s7 }
  0x40   : > { %p1338_p5 = pneg %p1337_p3  ;;  %p1342_p2 = por %p1341_p9, %p1340_p7 }
  0x42   : > { %p1344_p4 = por %p1343_p1, %p1342_p2 }
  0x44   : > { %p1345_p6 = pnand %p1344_p4, %p1338_p5 }
  0x46   : > { %1348 = shalt.err (!%p1345_p6)
}
  0x47   : > { %s1349_s15 = scalar_lea.vmem %s1624_s11, 128  ;;  %s1473_s16 = smov [#allocation2]  }
  0x48   : > { %p1350_p8 = scmp.ne.s32.totalorder %s1624_s11, %s1349_s15  ;;  %s1354_s20 = sshll.u32 %s1473_s16, 4  ;;  %s1355_s20 = int_to_ptr.vmem [resolvable:$false] %s1354_s20 }
  0x49   : > { %s1356_s23 = scalar_lea.vmem %s1355_s20, 256  ;;  %p1357_p3 = scmp.lt.s32.totalorder %s1624_s11, %s1355_s20 }
  0x4a   : > { %p1352_p10 = pnand %p1350_p8, %p1336_p0  ;;  %p1358_p7 = scmp.lt.s32.totalorder %s1356_s23, %s1349_s15 }
  0x4c   : > { %p1353_p13 = pneg %p1352_p10  ;;  %p1359_p9 = por %p1358_p7, %p1357_p3 }
  0x4e   : > { %p1360_p2 = pnand %p1359_p9, %p1353_p13 }
  0x50   : > { %1363 = shalt.err (!%p1360_p2)
}
  0x51   : > { %1247 = dma.hbm_to_vmem [thread:$0]  (!%p1620_p11), %s1617_s7, 128, %s1624_s11, %s232_s12  }
  0x52   : > { %s249_s4 = sand.u32 1, %s1468_s24   ;;  %s253_s13 = scalar_lea.vmem [#allocation5], %s1612_s17 }
  0x53   : > { %s260_s26 = sshll.u32 %s253_s13, 4  ;;  %s250_s8 = scalar_lea.sflag [#allocation6], %s249_s4  ;;  %s261_s26 = int_to_ptr.vmem [resolvable:$true] %s260_s26 }
  0x54   : > { %s1364_s18 = scalar_lea.hbm %s1629_s30, 128  ;;  %s1369_s16 = scalar_lea.hbm %s1794_s1, 256 }
  0x55   : > { %p1365_p5 = scmp.ne.s32.totalorder %s1629_s30, %s1364_s18  ;;  %p1370_p6 = scmp.lt.u32.totalorder %s1629_s30, %s1794_s1 }
  0x56   : > { %p1371_p8 = scmp.lt.u32.totalorder %s1369_s16, %s1364_s18  ;;  %p1373_p13 = scmp.lt.u32.totalorder %s1364_s18, %s1629_s30 }
  0x57   : > { %p1367_p1 = pnand %p1365_p5, %p1336_p0 }
  0x58   : > { %p1372_p10 = por %p1371_p8, %p1370_p6 }
  0x59   : > { %p1368_p4 = pneg %p1367_p1 }
  0x5a   : > { %p1374_p3 = por %p1373_p13, %p1372_p10 }
  0x5c   : > { %p1375_p7 = pnand %p1374_p3, %p1368_p4 }
  0x5e   : > { %1378 = shalt.err (!%p1375_p7)
}
  0x5f   : > { %s1379_s17 = scalar_lea.vmem %s261_s26, 128  ;;  %s1474_s7 = smov [#allocation5]  }
  0x60   : > { %p1380_p9 = scmp.ne.s32.totalorder %s261_s26, %s1379_s17  ;;  %s1384_s11 = sshll.u32 %s1474_s7, 4  ;;  %s1385_s11 = int_to_ptr.vmem [resolvable:$false] %s1384_s11 }
  0x61   : > { %s1386_s12 = scalar_lea.vmem %s1385_s11, 256  ;;  %p1387_p1 = scmp.lt.s32.totalorder %s261_s26, %s1385_s11 }
  0x62   : > { %p1382_p2 = pnand %p1380_p9, %p1336_p0  ;;  %p1388_p12 = scmp.lt.s32.totalorder %s1386_s12, %s1379_s17 }
  0x64   : > { %p1383_p5 = pneg %p1382_p2  ;;  %p1389_p6 = por %p1388_p12, %p1387_p1 }
  0x66   : > { %p1390_p8 = pnand %p1389_p6, %p1383_p5 }
  0x68   : > { %1393 = shalt.err (!%p1390_p8)
}
  0x69   : > { %1250 = dma.hbm_to_vmem [thread:$0]  (!%p1620_p11), %s1629_s30, 128, %s261_s26, %s250_s8  }
  0x6a   : > { %p1816_p4 = scmp.ne.s32.totalorder %s1809_s29, 0 }
  0x6b   : > { %s1680_s4 = sand.u32 (!%p1816_p4), 1, %s1460_s22   ;;  %p1817_p0 = scmp.ne.s32.totalorder (!%p1816_p4), %s1807_s27, 0 }
  0x6c   : > { %281 = sbr.rel (%p1816_p4) target bundleno = 1114 (0x45a), region = 44  ;;  %s1098_s13 = sshll.u32 (!%p1816_p4), %s1680_s4, 3 }
  0x6d   : > { %s284_s18 = scalar_lea.sflag (!%p1816_p4), [#allocation3], %s1680_s4  ;;  %s287_s10 = scalar_lea.vmem (!%p1816_p4), [#allocation2], %s1098_s13 }
  0x73   : > { %1439 = dma.done.wait (%p1817_p0), %s284_s18, 128  }
  0x74   : > { %1441 = vsyncadd (%p1817_p0), %s284_s18, 4294967168  ;;  %s292_s19 = sand.u32 1, %s1536_s25   ;;  %s296_s29 = scalar_lea.vmem [#allocation5], %s1098_s13 }
  0x75   : > { %s293_s30 = scalar_lea.sflag [#allocation6], %s292_s19 }
  0x76   : > { %1443 = dma.done.wait (%p1817_p0), %s293_s30, 128  }
  0x77   : > { %1445 = vsyncadd (%p1817_p0), %s293_s30, 4294967168  ;;  %p1818_p12 = scmp.eq.s32.totalorder %s1536_s25, 0 }
  0x79   : > { %1447 = dma.done.wait (%p1818_p12), [#allocation6], 1536   ;;  %p1819_p11 = pmov %p1818_p12 }
  0x7a   : > { %v1475_v0 = vmov 0.0   ;;  %vm1476_vm0 = vmmov 0   ;;  %vm356_vm1 = vcmask 261120   ;;  %v1699_v1 = vld [vmem:[%s296_s29] sm:$0xff]  ;;  %v1703_v2 = vld [vmem:[%s287_s10] sm:$0xff]  ;;  %p340_p10 = scmp.lt.s32.totalorder %s1536_s25, 1 }
  0x7b   : > { %1449 = vsyncadd (%p1819_p11), [#allocation6], 4294965760  ;;  %1149 = vmatprep.subr.mxu1 %v1475_v0  ;;  %1151 = vmatprep.mubr.msk.f32.mxu1 %vm1476_vm0, %v1475_v0  ;;  %vm433_vm2 = vcmask 64512   ;;  %v686_v23 = vld [vmem:[#allocation7] sm:$0xff]  ;;  %v687_v24 = vld [vmem:[#allocation7 + $0x8] sm:$0xff]  ;;  %s1101_s17 = sshll.u32 %s1680_s4, 4 }
  0x7c   : > { %1159 = vmatprep.subr.mxu0 %v1475_v0  ;;  %1161 = vmatprep.mubr.msk.f32.mxu0 %vm1476_vm0, %v1475_v0  ;;  %s341_s27 = scalar_select %p340_p10, %s1536_s25, 1  ;;  %v1210_v25 = vpack.c.bf16 %v687_v24, %v686_v23  ;;  %v691_v26 = vld [vmem:[#allocation7 + $0x20] sm:$0xff]  ;;  %v692_v27 = vld [vmem:[#allocation7 + $0x28] sm:$0xff]  ;;  %v688_v35 = vld [vmem:[#allocation7 + $0x10] sm:$0xff] }
  0x7d   : > { %1150 = vmatpush3.xpose.msk.msra.mxu1 %vm356_vm1, %v1699_v1  ;;  %1160 = vmatpush3.msra.mxu0 %v1699_v1  ;;  %v1202_v28 = vpack.c.bf16 %v692_v27, %v691_v26  ;;  %v689_v36 = vld [vmem:[#allocation7 + $0x18] sm:$0xff]  ;;  %v696_v42 = vld [vmem:[#allocation7 + $0x40] sm:$0xff]  ;;  %v697_v43 = vld [vmem:[#allocation7 + $0x48] sm:$0xff]  ;;  %s339_s12 = scalar_lea.vmem [#allocation8], %s1101_s17  ;;  %s1122_s18 = sshll.u32 %s1536_s25, 8 }
  0x7e   : > { %1154 = vmatprep.subr.mxu1 %v1475_v0  ;;  %s345_s15 = scalar_lea.vmem %s1796_s3, %s341_s27  ;;  %s342_s23 = scalar_lea.vmem %s1795_s2, %s341_s27  ;;  %1211 = vmatprep.subr.bf16.mxu0 %v1210_v25  ;;  %v1214_v41 = vpack.c.bf16 %v689_v36, %v688_v35  ;;  %v1218_v46 = vpack.c.bf16 %v697_v43, %v696_v42  ;;  %v693_v47 = vld [vmem:[#allocation7 + $0x30] sm:$0xff]  ;;  %v694_v48 = vld [vmem:[#allocation7 + $0x38] sm:$0xff]  ;;  %v1116_v62 = vld [vmem:[%s1798_s5] ss:$0 sm:$0xff] }
  0x7f   : > { %v1102_v3 = vld [vmem:[%s345_s15] ss:$0 sm:$0xff]  ;;  %v1206_v49 = vpack.c.bf16 %v694_v48, %v693_v47  ;;  %v698_v50 = vld [vmem:[#allocation7 + $0x50] sm:$0xff]  ;;  %v699_v51 = vld [vmem:[#allocation7 + $0x58] sm:$0xff]  ;;  %s966_s13 = sshll.u32 %s339_s12, 4  ;;  %s1749_s30 = scalar_lea.hbm %s1799_s6, %s1122_s18  ;;  %s1744_s13 = int_to_ptr.vmem [resolvable:$true] %s966_s13 }
  0x80   : > { %1152 = vmatmul.mubr.msk.f32.vlgmr.msra.gmra.mrb[0].mxu1 %vm356_vm1, %v1703_v2  ;;  %v1105_v7 = vld [vmem:[%s342_s23] ss:$0 sm:$0xff]  ;;  %v1222_v52 = vpack.c.bf16 %v699_v51, %v698_v50  ;;  %s953_s29 = scalar_lea.sflag [#allocation4], %s1680_s4  ;;  %s1394_s27 = scalar_lea.vmem %s1744_s13, 256 }
  0x81   : > { %1155 = vmatpush3.xpose.msk.msra.mxu1 %vm356_vm1, %v1703_v2  ;;  %1156 = vmatprep.mubr.msk.f32.mxu1 %vm1476_vm0, %v1475_v0  ;;  %p1395_p13 = scmp.ne.s32.totalorder %s1744_s13, %s1394_s27  ;;  %p1820_p3 = scmp.ne.s32.totalorder %s1814_s14, 0 }
  0x82   : > { %1164 = vmatprep.subr.mxu1 %v1475_v0  ;;  %s1477_s25 = smov [#allocation8]  }
  0x83   : > { %p1396_p7 = pnand %p1395_p13, %p1820_p3  ;;  %s1398_s26 = sshll.u32 %s1477_s25, 4  ;;  %s1399_s26 = int_to_ptr.vmem [resolvable:$false] %s1398_s26 }
  0x84   : > { %1157 = vmatmul.mubr.msk.f32.vlgmr.msra.gmra.mrb[2].mxu1 %vm356_vm1, %v1699_v1  ;;  %s1400_s8 = scalar_lea.vmem %s1399_s26, 512  ;;  %p1401_p2 = scmp.lt.s32.totalorder %s1744_s13, %s1399_s26 }
  0x85   : > { %1165 = vmatpush3.msra.mxu1 %v1703_v2  ;;  %1166 = vmatprep.mubr.msk.f32.mxu1 %vm1476_vm0, %v1475_v0  ;;  %p1397_p9 = pneg %p1396_p7  ;;  %p1402_p5 = scmp.lt.s32.totalorder %s1400_s8, %s1394_s27 }
  0x86   : > { %1203 = vmatprep.subr.bf16.mxu1 %v1202_v28 }
  0x87   : > { %p1403_p1 = por %p1402_p5, %p1401_p2 }
  0x89   : > { %p1404_p6 = pnand %p1403_p1, %p1397_p9 }
 0x153   : > { %v429_v4 = vpop.f32.mrb[0].mxu1 }
 0x154   : > { %v430_v5 = vadd.f32 %v1102_v3, %v429_v4  ;;  %v1153_v6 = vpop.f32.mrb[1].mxu1 }
 0x156   : > { %v434_v8 = vsel %vm433_vm2, %v430_v5, -inf }
 0x157   : > { %435 = vmax.xlane.f32.xlu0 %v434_v8  ;;  %v520_v9 = vpop.f32.mrb[2].mxu1 }
 0x158   : > { %v521_v10 = vadd.f32 %v1105_v7, %v520_v9  ;;  %v1158_v11 = vpop.f32.mrb[3].mxu1 }
 0x15a   : > { %v524_v12 = vsel %vm433_vm2, %v521_v10, -inf }
 0x15b   : > { %525 = vmax.xlane.f32.xlu0 %v524_v12 }
 0x1e4   : > { %v436_v13 = vpop.xlane.xlu0 %435 }
 0x1e5   : > { %v437_v14 = vsub.f32 %v430_v5, %v436_v13 }
 0x1e7   : > { %v438_v15 = vmul.f32 1.442695, %v437_v14 }
 0x1e8   : > { %v526_v16 = vpop.xlane.xlu0 %525 }
 0x1e9   : > { %1298 = vpow2.f32 %v438_v15  ;;  %v527_v17 = vsub.f32 %v521_v10, %v526_v16 }
 0x1eb   : > { %v528_v18 = vmul.f32 1.442695, %v527_v17 }
 0x1ed   : > { %1300 = vpow2.f32 %v528_v18 }
 0x1f3   : > { %v1299_v19 = vpop.eup %1298 }
 0x1f4   : > { %v440_v20 = vsel %vm433_vm2, %v1299_v19, 0.0 }
 0x1f5   : > { %441 = vadd.xlane.f32.xlu1 %v440_v20 }
 0x1f7   : > { %v1301_v21 = vpop.eup %1300 }
 0x1f8   : > { %v530_v22 = vsel %vm433_vm2, %v1301_v21, 0.0 }
 0x1f9   : > { %531 = vadd.xlane.f32.xlu1 %v530_v22 }
 0x282   : > { %v442_v29 = vpop.xlane.xlu1 %441 }
 0x283   : > { %1302 = vrcp.f32 %v442_v29 }
 0x286   : > { %v532_v30 = vpop.xlane.xlu1 %531 }
 0x287   : > { %1304 = vrcp.f32 %v532_v30 }
 0x28d   : > { %v1303_v31 = vpop.eup %1302 }
 0x28e   : > { %v444_v32 = vmul.f32 %v1303_v31, %v442_v29 }
 0x290   : > { %v445_v33 = vsub.f32 2.0, %v444_v32 }
 0x291   : > { %v1305_v34 = vpop.eup %1304 }
 0x292   : > { %v446_v37 = vmul.f32 %v1303_v31, %v445_v33  ;;  %v534_v38 = vmul.f32 %v1305_v34, %v532_v30 }
 0x294   : > { %v447_v39 = vmul.f32 %v1299_v19, %v446_v37  ;;  %v535_v40 = vsub.f32 2.0, %v534_v38 }
 0x296   : > { %v536_v44 = vmul.f32 %v1305_v34, %v535_v40  ;;  %1162 = vmatmul.mubr.msk.f32.vlgmr.msra.gmra.mrb[0].mxu0 %vm433_vm2, %v447_v39 }
 0x297   : > { %1213 = vmatpush3.bf16.msra.mxu0 %v1210_v25  ;;  %1188 = vmatprep.mubr.msk.f32.mxu0 %vm356_vm1, %v1703_v2 }
 0x298   : > { %v537_v45 = vmul.f32 %v1301_v21, %v536_v44  ;;  %1215 = vmatprep.subr.bf16.mxu0 %v1214_v41 }
 0x29a   : > { %1167 = vmatmul.mubr.msk.f32.vlgmr.msra.gmra.mrb[4].mxu1 %vm433_vm2, %v537_v45 }
 0x29b   : > { %1217 = vmatpush3.bf16.msra.mxu0 %v1214_v41  ;;  %1205 = vmatpush3.bf16.msra.mxu1 %v1202_v28 }
 0x29c   : > { %1219 = vmatprep.subr.bf16.mxu0 %v1218_v46  ;;  %1207 = vmatprep.subr.bf16.mxu1 %v1206_v49 }
 0x29e   : > { %1189 = vmatmul.mubr.msk.f32.vlgmr.msra.gmra.mrb[2].mxu0 %vm356_vm1, %v1699_v1 }
 0x29f   : > { %1221 = vmatpush3.bf16.msra.mxu0 %v1218_v46  ;;  %1209 = vmatpush3.bf16.msra.mxu1 %v1206_v49 }
 0x2a0   : > { %1223 = vmatprep.subr.bf16.mxu0 %v1222_v52 }
 0x2a3   : > { %1225 = vmatpush3.bf16.msra.mxu0 %v1222_v52 }
 0x369   : > { %v607_v53 = vpop.f32.mrb[0].mxu0 }
 0x36a   : > { %v684_v54 = vmul.f32 %v607_v53, %v1703_v2  ;;  %v1163_v55 = vpop.f32.mrb[1].mxu0  ;;  %1177 = vmatprep.mubr.msk.f32.mxu1 %vm356_vm1, %v607_v53 }
 0x36c   : > { %1199 = vmatprep.mubr.msk.f32.mxu0 %vm356_vm1, %v684_v54 }
 0x36d   : > { %v680_v56 = vpop.f32.mrb[4].mxu1 }
 0x36e   : > { %v685_v57 = vmul.f32 %v680_v56, %v1699_v1  ;;  %v1168_v58 = vpop.f32.mrb[5].mxu1  ;;  %1178 = vmatmul.mubr.msk.f32.vlgmr.msra.gmra.mrb[6].mxu1 %vm356_vm1, %v680_v56 }
 0x370   : > { %1200 = vmatmul.mubr.msk.f32.vlgmr.msra.gmra.mrb[2].mxu0 %vm356_vm1, %v685_v57 }
 0x441   : > { %v1179_v59 = vpop.f32.mrb[6].mxu1 }
 0x442   : > { %v772_v60 = vpop.f32.mrb[7].mxu1 }
 0x443   : > { %v1201_v61 = vpop.f32.mrb[2].mxu0 }
 0x444   : > { %v1226_v63 = vadd.f32 %v1201_v61, %v1179_v59  ;;  %v928_v0 = vpop.f32.mrb[3].mxu0 }
 0x445   : > { %v1227_v1 = vadd.f32 %v928_v0, %v772_v60 }
 0x446   : > { %v947_v2 = vadd.f32 %v1226_v63, %v1116_v62 }
 0x447   : > { %v946_v3 = vadd.f32 %v1227_v1, %v1116_v62 }
 0x448   : > { %v949_v4 = vmax.f32 %v947_v2, 0.0 }
 0x449   : > { %v948_v5 = vmax.f32 %v946_v3, 0.0 }
 0x44a   : > { %951 = vst [vmem:[%s339_s12 + $0x8] sm:$0xff] %v949_v4 }
 0x44b   : > { %950 = vst [vmem:[%s339_s12] sm:$0xff] %v948_v5 }
 0x44c   : > { %1407 = shalt.err (!%p1404_p6)
}
 0x44d   : > { %s1408_s15 = scalar_lea.hbm %s1749_s30, 256  ;;  %s1412_s23 = scalar_lea.hbm %s1799_s6, 512 }
 0x44e   : > { %p1409_p8 = scmp.ne.s32.totalorder %s1749_s30, %s1408_s15  ;;  %p1413_p12 = scmp.lt.u32.totalorder %s1749_s30, %s1799_s6 }
 0x44f   : > { %p1414_p11 = scmp.lt.u32.totalorder %s1412_s23, %s1408_s15  ;;  %p1416_p13 = scmp.lt.u32.totalorder %s1408_s15, %s1749_s30 }
 0x450   : > { %p1410_p4 = pnand %p1409_p8, %p1820_p3 }
 0x451   : > { %p1415_p10 = por %p1414_p11, %p1413_p12 }
 0x452   : > { %p1411_p0 = pneg %p1410_p4 }
 0x453   : > { %p1417_p7 = por %p1416_p13, %p1415_p10 }
 0x455   : > { %p1418_p9 = pnand %p1417_p7, %p1411_p0 }
 0x457   : > { %1421 = shalt.err (!%p1418_p9)
}
 0x458   : > { %s1478_s11 = smov 128   ;;  %s1479_s12 = smov 8  }
 0x459   : > { %1238 = dma.vmem_to_hbm [thread:$0]  (%p1820_p3), %s1744_s13, 256, %s1749_s30, %s953_s29, %s1478_s11, %s1478_s11, %s1479_s12  }
 0x45a PF: > { %s981_s18 = sand.u32 1, %s1456_s21   ;;  %p1821_p2 = scmp.ne.s32.totalorder %s1808_s28, 0 }
 0x45b   : > { %p1822_p5 = scmp.ge.s32.totalorder %s1468_s24, 2  ;;  %s982_s10 = scalar_lea.sflag [#allocation4], %s981_s18 }
 0x45d   : > { %p1252_p1 = pnand %p1822_p5, %p1821_p2 }
 0x45f   : > { %1451 = dma.done.wait (!%p1252_p1), %s982_s10, 256  }
 0x460   : > { %1453 = vsyncadd (!%p1252_p1), %s982_s10, 4294967040  ;;  %s1823_s19 = sld [smem:[#allocation13_spill]]  ;;  %s1824_s23 = sld [smem:[#allocation14_spill]] }
 0x461   : > { %p22_p6 = scmp.ge.s32.totalorder %s1571_s9, 4   ;;  %s1825_s21 = smov %s1460_s22 }
 0x462   : > { %s1827_s24 = smov %s1571_s9 }
 0x463   :  { %24 = sbr.rel (!%p22_p6) target bundleno = 9 (0x9), region = 114 }
 0x466   : > { %s1826_s22 = smov %s1823_s19 }
 0x46a   :  { %987 = vsyncpa [#allocation3], 1 }
 0x46b   :  { %989 = vsyncpa [#allocation3 + $0x1], 1 }
 0x46c   :  { %990 = vsyncpa [#allocation6], 1 }
 0x46d   :  { %992 = vsyncpa [#allocation6 + $0x1], 1 }
 0x46e   :  { %993 = vsyncpa [#allocation4], 1 }
 0x46f   :  { %995 = vsyncpa [#allocation4 + $0x1], 1 }

</bundles_post_ra>
